<compile_context>
chip_gen: v7x
topology: tpu7x:2x2x1
jax: 0.10.0
libtpu: 0.0.40
codegen_flags: <defaults>
</compile_context>

<pallas_src>
import jax
import jax.numpy as jnp
from jax.experimental import pallas as pl
from jax.experimental.pallas import tpu as pltpu


_TARGET_BLOCK_BYTES = 2 * 1024 * 1024   # aligned path: ~2 MiB payload blocks
_RAGGED_BLOCK_BYTES = 256 * 1024        # ragged (1, bn) blocks: the size-1
                                        # sublane dim may be padded 8x in VMEM,
                                        # so keep payload small enough that
                                        # 4 buffers stay well under 16 MiB.


def _coloring_kernel(scale_ref, x_ref, o_ref):
    # scale_ref lives in SMEM and holds [sigma, mu] as f32 scalars.
    sigma = scale_ref[0]
    mu = scale_ref[1]
    # Compute in f32 (safe on v5e which has no bf16 VALU); kernel is HBM-bound
    # so the upcast is hidden under DMA.  Cast back to the input dtype.
    x = x_ref[...].astype(jnp.float32)
    o_ref[...] = (sigma * x + mu).astype(o_ref.dtype)


def _aligned_layout(n, itemsize):
    """Lane-dense (rows, cols) view and row-block size for n % 128 == 0."""
    for cols in (4096, 2048, 1024, 512, 256, 128):
        if n % cols == 0:
            break
    rows = n // cols
    # Sublane block extent: a multiple of the packing factor (8 f32 / 16 bf16 /
    # 32 int8), sized so one block carries ~2 MiB of payload.
    sub_mult = 8 * max(1, 4 // itemsize)
    br = max(1, _TARGET_BLOCK_BYTES // (cols * itemsize))
    br = max(sub_mult, (br // sub_mult) * sub_mult)
    if rows <= sub_mult:
        br = rows                      # cannot legally split further
    else:
        # Never collapse to a single grid step: the "parallel" grid axis is
        # what lets both v7x TensorCores stream independently.
        half = max(sub_mult, ((rows // 2) // sub_mult) * sub_mult)
        br = min(br, half)
    return rows, cols, br


def _ragged_block(n, itemsize):
    """Lane-tile size for the (1, n) view when n is not a multiple of 128."""
    bn = max(128, (_RAGGED_BLOCK_BYTES // itemsize) // 128 * 128)
    bn = min(bn, pl.cdiv(n, 128) * 128)     # never bigger than one padded row
    if n > 128:
        # Keep >= 2 grid steps so both v7x TensorCores get work.
        half = max(128, pl.cdiv(pl.cdiv(n, 2), 128) * 128)
        bn = min(bn, half)
    return bn


def coloring(x, mu=0.0, sigma=1.0):
    """y = sigma * x + mu, computed in a Pallas TPU kernel."""
    orig_shape = x.shape
    dtype = x.dtype
    n = x.size
    if n == 0:
        return x

    itemsize = jnp.dtype(dtype).itemsize

    # Runtime scalars in SMEM: works with python floats *and* traced buffers,
    # and never forces a recompile per (mu, sigma) value.
    scale = jnp.stack([jnp.asarray(sigma, jnp.float32),
                       jnp.asarray(mu, jnp.float32)])

    xf = jnp.ravel(x)

    if n % 128 == 0:
        rows, cols, br = _aligned_layout(n, itemsize)
        x2 = xf.reshape(rows, cols)
        grid = (pl.cdiv(rows, br),)
        block = (br, cols)
        index_map = lambda i: (i, 0)
    else:
        # Ragged path: view as (1, n) and tile along lanes; Pallas masks the
        # partial tail block, so there is no pad or post-slice HBM traffic.
        bn = _ragged_block(n, itemsize)
        x2 = xf.reshape(1, n)
        grid = (pl.cdiv(n, bn),)
        block = (1, bn)
        index_map = lambda i: (0, i)

    out2 = pl.pallas_call(
        _coloring_kernel,
        out_shape=jax.ShapeDtypeStruct(x2.shape, dtype),
        grid=grid,
        in_specs=[
            pl.BlockSpec(memory_space=pltpu.MemorySpace.SMEM),  # [sigma, mu]
            pl.BlockSpec(block, index_map),
        ],
        out_specs=pl.BlockSpec(block, index_map),
        compiler_params=pltpu.CompilerParams(
            dimension_semantics=("parallel",)),  # v7x: shard across both TCs
    )(scale, x2)

    # Note: for sub-VMEM inputs XLA's fused elementwise would be at least as
    # fast as any standalone kernel; we still run the Pallas path here so it
    # is exercised/testable.  Output dtype follows x (float use assumed).
    return out2.reshape(orig_shape)


if __name__ == "__main__":
    key = jax.random.PRNGKey(0)
    k0, k1 = jax.random.split(key)

    mu = 0.5
    sigma = 2.0

    # Small NCHW-like input consistent with the module (elementwise op).
    x = jax.random.normal(k0, (2, 4, 16, 16), dtype=jnp.float32)
    y = jax.block_until_ready(coloring(x, mu=mu, sigma=sigma))
    y_ref = sigma * x + mu
    assert y.shape == x.shape and y.dtype == x.dtype
    assert jnp.allclose(y, y_ref, atol=1e-6, rtol=1e-6)

    # Slightly larger (still small) input that exercises a multi-step
    # "parallel" grid with full-sized lane-dense blocks.
    x2 = jax.random.normal(k1, (8, 4, 64, 128), dtype=jnp.float32)
    y2 = jax.block_until_ready(coloring(x2, mu=mu, sigma=sigma))
    y2_ref = sigma * x2 + mu
    assert y2.shape == x2.shape and y2.dtype == x2.dtype
    assert jnp.allclose(y2, y2_ref, atol=1e-6, rtol=1e-6)

    print("KERNEL_OK")
</pallas_src>

<mosaic_0001>
module attributes {stable_mosaic.version = 11 : i64} {
  func.func @_coloring_kernel(%arg0: i32, %arg1: memref<2xf32, #tpu.memory_space<smem>>, %arg2: memref<1x2048xf32, #tpu.memory_space<vmem>>, %arg3: memref<1x2048xf32, #tpu.memory_space<vmem>>) attributes {dimension_semantics = [#tpu.dimension_semantics<parallel>], iteration_bounds = array<i64: 1>, scalar_prefetch = 0 : i64, scratch_operands = 0 : i64, tpu.core_type = #tpu.core_type<tc>, window_params = [{transform_indices = @transform_0, window_bounds = array<i64: 2>}, {transform_indices = @transform_1, window_bounds = array<i64: 1, 2048>}, {transform_indices = @transform_2, window_bounds = array<i64: 1, 2048>}]} {
    %c0 = arith.constant 0 : index
    %0 = memref.load %arg1[%c0] : memref<2xf32, #tpu.memory_space<smem>>
    %c1 = arith.constant 1 : index
    %1 = memref.load %arg1[%c1] : memref<2xf32, #tpu.memory_space<smem>>
    %c0_0 = arith.constant 0 : index
    %c0_1 = arith.constant 0 : index
    %2 = vector.load %arg2[%c0_0, %c0_1] : memref<1x2048xf32, #tpu.memory_space<vmem>>, vector<1x2048xf32>
    %3 = vector.broadcast %0 : f32 to vector<1x2048xf32>
    %4 = arith.mulf %3, %2 : vector<1x2048xf32>
    %5 = vector.broadcast %1 : f32 to vector<1x2048xf32>
    %6 = arith.addf %4, %5 : vector<1x2048xf32>
    %c0_2 = arith.constant 0 : index
    %c0_3 = arith.constant 0 : index
    %7 = vector.load %arg3[%c0_2, %c0_3] : memref<1x2048xf32, #tpu.memory_space<vmem>>, vector<1x2048xf32>
    tpu.vector_store %arg3[%c0_2, %c0_3], %6 {strides = array<i32>} : memref<1x2048xf32, #tpu.memory_space<vmem>>, vector<1x2048xf32>,
    return
  }
  func.func @transform_0(%arg0: i32) -> i32 {
    %c0_i32 = arith.constant 0 : i32
    %c0_i32_0 = arith.constant 0 : i32
    return %c0_i32 : i32
  }
  func.func @transform_1(%arg0: i32) -> (i32, i32) {
    %c0_i32 = arith.constant 0 : i32
    %c0_i32_0 = arith.constant 0 : i32
    return %arg0, %c0_i32 : i32, i32
  }
  func.func @transform_2(%arg0: i32) -> (i32, i32) {
    %c0_i32 = arith.constant 0 : i32
    %c0_i32_0 = arith.constant 0 : i32
    return %arg0, %c0_i32 : i32, i32
  }
}

</mosaic_0001>

<bundles_post_ra>
// kernel: tpu_custom_call.1
= control target key start
LH: loop header
LB: loop body
LE: loop exit
PB: predicated region body
PF: predicated region fallthrough
CT: control target
= control target key end

     0   :  { %7 = vsyncpa [#allocation5], 0  ;;  %s181_s0 = inlined_call_operand.hbm [shape: f32[2], index: 0, kind: input, shape index: {}]   ;;  %s182_s1 = inlined_call_operand.hbm [shape: f32[1,2048], index: 1, kind: input, shape index: {}]   ;;  %s183_s2 = inlined_call_operand.hbm [shape: f32[1,2048], index: 2, kind: output, shape index: {}]  }
   0x1   :  { %8 = vsyncpa [#allocation3], 0 }
   0x2   :  { %9 = vsyncpa [#allocation4], 0  ;;  %s67_s11 = scalar_lea.hbm %s181_s0, 16 }
   0x3   :  { %p68_p0 = scmp.ne.s32.totalorder %s181_s0, %s67_s11  ;;  %p71_p1 = scmp.lt.u32.totalorder %s67_s11, %s181_s0 }
   0x5   :  { %p73_p2 = pnand %p71_p1, %p68_p0 }
   0x7   :  { %76 = shalt.err (!%p73_p2)
}
   0x8   :  { %s127_s16 = smov [#allocation2]   ;;  %s128_s19 = smov [#allocation6]  }
   0x9   :  { %17 = dma.hbm_to_smem %s181_s0, 16, %s127_s16, [#allocation5]  }
   0xa   :  { %s24_s20 = sshll.u32 %s128_s19, 4  ;;  %s77_s23 = scalar_lea.hbm %s182_s1, 256  ;;  %s25_s20 = int_to_ptr.vmem [resolvable:$true] %s24_s20 }
   0xb   :  { %p78_p3 = scmp.ne.s32.totalorder %s182_s1, %s77_s23  ;;  %p81_p4 = scmp.lt.u32.totalorder %s77_s23, %s182_s1 }
   0xd   :  { %p83_p5 = pnand %p81_p4, %p78_p3 }
   0xf   :  { %86 = shalt.err (!%p83_p5)
}
  0x10   :  { %s87_s28 = scalar_lea.vmem %s25_s20, 256  ;;  %p92_p7 = scmp.lt.s32.totalorder %s25_s20, %s25_s20 }
  0x11   :  { %p88_p6 = scmp.ne.s32.totalorder %s25_s20, %s87_s28  ;;  %p93_p8 = scmp.lt.s32.totalorder %s87_s28, %s87_s28 }
  0x13   :  { %p94_p9 = por %p93_p8, %p92_p7 }
  0x15   :  { %p95_p10 = pnand %p94_p9, %p88_p6 }
  0x17   :  { %98 = shalt.err (!%p95_p10)
}
  0x18   :  { %27 = dma.hbm_to_vmem [thread:$0]  %s182_s1, 256, %s25_s20, [#allocation3]  }
  0x19   :  { %121 = dma.done.wait [#allocation5], 16  }
  0x1a   :  { %122 = vsyncadd [#allocation5], 4294967280 }
  0x1b   :  { %123 = dma.done.wait [#allocation3], 256  }
  0x1c   :  { %124 = vsyncadd [#allocation3], 4294967040 }
  0x1d   :  { %34 = sfence }
  0x1e   :  { %s35_s30 = sld [smem:[#allocation2]]  ;;  %s63_s3 = sld [smem:[#allocation2 + $0x1]]  ;;  %v37_v0 = vld [vmem:[#allocation6] sm:$0xff]  ;;  %v38_v1 = vld [vmem:[#allocation6 + $0x8] sm:$0xff] }
  0x1f   :  { %s129_s4 = smov [#allocation7]  }
  0x20   :  { %s53_s5 = sshll.u32 %s129_s4, 4  ;;  %s54_s5 = int_to_ptr.vmem [resolvable:$true] %s53_s5 }
  0x21   :  { %s99_s1 = scalar_lea.vmem %s54_s5, 256  ;;  %p104_p12 = scmp.lt.s32.totalorder %s54_s5, %s54_s5 }
  0x22   :  { %p100_p11 = scmp.ne.s32.totalorder %s54_s5, %s99_s1  ;;  %p105_p13 = scmp.lt.s32.totalorder %s99_s1, %s99_s1 }
  0x24   :  { %v39_v2 = vstv %s35_s30  ;;  %v42_v3 = vstv %s63_s3  ;;  %p106_p0 = por %p105_p13, %p104_p12 }
  0x25   :  { %v40_v4 = vmul.f32 %v39_v2, %v37_v0  ;;  %v41_v5 = vmul.f32 %v39_v2, %v38_v1 }
  0x26   :  { %p107_p1 = pnand %p106_p0, %p100_p11 }
  0x27   :  { %v43_v6 = vadd.f32 %v42_v3, %v40_v4  ;;  %v44_v7 = vadd.f32 %v42_v3, %v41_v5 }
  0x29   :  { %45 = vst [vmem:[#allocation7] sm:$0xff] %v43_v6  ;;  %46 = vst [vmem:[#allocation7 + $0x8] sm:$0xff] %v44_v7 }
  0x2a   :  { %110 = shalt.err (!%p107_p1)
}
  0x2b   :  { %s111_s8 = scalar_lea.hbm %s183_s2, 256 }
  0x2c   :  { %p112_p2 = scmp.ne.s32.totalorder %s183_s2, %s111_s8  ;;  %p115_p3 = scmp.lt.u32.totalorder %s111_s8, %s183_s2 }
  0x2e   :  { %p117_p4 = pnand %p115_p3, %p112_p2 }
  0x30   :  { %120 = shalt.err (!%p117_p4)
}
  0x31   :  { %56 = dma.vmem_to_hbm [thread:$0]  %s54_s5, 256, %s183_s2, [#allocation4]  }
  0x32   :  { %125 = dma.done.wait [#allocation4], 256  }
  0x33   :  { %126 = vsyncadd [#allocation4], 4294967040 }
  0x34   :  { %60 = vsyncpa [#allocation3], 1 }
  0x35   :  { %61 = vsyncpa [#allocation4], 1 }
  0x36   :  { %62 = vsyncpa [#allocation5], 1 }

</bundles_post_ra>
